<compile_context>
chip_gen: v7x
topology: tpu7x:2x2x1
jax: 0.10.0
libtpu: 0.0.40
codegen_flags: <defaults>
</compile_context>

<pallas_src>
import functools

import numpy as np
import jax
import jax.numpy as jnp
from jax.experimental import pallas as pl
from jax.experimental.pallas import tpu as pltpu


# ---------------------------------------------------------------------------
# Parameter init (mimics torch defaults) and pure-JAX reference forward.
# ---------------------------------------------------------------------------
def init_params(key, x_dim, tower_dims, h_dim, mlp_dims):
    """nn.Linear / nn.Bilinear default init: U(-1/sqrt(fan_in), 1/sqrt(fan_in)).

    Weights stored as (in_features, out_features) so y = x @ W + b.
    """
    def linear(k, fin, fout):
        kw, kb = jax.random.split(k)
        bound = 1.0 / np.sqrt(fin)
        w = jax.random.uniform(kw, (fin, fout), jnp.float32, -bound, bound)
        b = jax.random.uniform(kb, (fout,), jnp.float32, -bound, bound)
        return w, b

    n_keys = 2 * len(tower_dims) + 2 + 1 + len(mlp_dims) + 1
    keys = iter(jax.random.split(key, n_keys))

    def mlp(dims, fin):
        layers = []
        for d in dims:
            layers.append(linear(next(keys), fin, d))
            fin = d
        return layers, fin

    p = {}
    p["tower1"], t_out = mlp(tower_dims, x_dim)
    p["tower2"], _ = mlp(tower_dims, x_dim)
    p["hash1"] = linear(next(keys), t_out, h_dim)
    p["hash2"] = linear(next(keys), t_out, h_dim)
    kw, kb = jax.random.split(next(keys))
    bound = 1.0 / np.sqrt(h_dim)
    p["bilin_w"] = jax.random.uniform(kw, (h_dim, h_dim), jnp.float32, -bound, bound)
    p["bilin_b"] = jax.random.uniform(kb, (), jnp.float32, -bound, bound)
    p["mlp"], m_out = mlp(mlp_dims, 2 * h_dim + 1)
    p["out"] = linear(next(keys), m_out, 1)
    return p


def reference_forward(x1, x2, p):
    """Pure-JAX replica of TwoTowerHashModel_V0.forward (return_only_hash=False)."""
    a = x1
    for w, b in p["tower1"]:
        a = jnp.maximum(a @ w + b, 0.0)
    out1 = a @ p["hash1"][0] + p["hash1"][1]

    c = x2
    for w, b in p["tower2"]:
        c = jnp.maximum(c @ w + b, 0.0)
    out2 = c @ p["hash2"][0] + p["hash2"][1]

    sim = jnp.einsum("bi,ij,bj->b", out1, p["bilin_w"], out2)[:, None] + p["bilin_b"]
    h = jnp.concatenate([out1, sim, out2], axis=1)
    for w, b in p["mlp"]:
        h = jnp.maximum(h @ w + b, 0.0)
    logits = h @ p["out"][0] + p["out"][1]
    similarity = jax.nn.sigmoid(logits).squeeze()
    return out1, out2, similarity


# ---------------------------------------------------------------------------
# Host-side packing: one contiguous (rows, PW) f32 slab of all parameters.
# ---------------------------------------------------------------------------
def pack_params(p, x_dim, tower_dims, h_dim, mlp_dims):
    """Pack all weights/biases into one (rows, PW) f32 slab.

    PW is the fused (two-tower, block-diagonal) lane width; every matrix is
    zero-padded to (PW, PW) so the forward is a chain of PW-wide matmuls and
    the zero lanes propagate harmlessly (relu(0) == 0).

    Slab row layout:
      mats  [0..L-1] : block-diag tower layers       (PW, PW) each
      mat   [L]      : block-diag hash1/hash2        (PW, PW)
      mat   [L+1]    : bilinear W placed at rows 0:h, cols h:2h
      mat   [L+2]    : first mlp layer, rows permuted for the packed `out`
      mats  [L+3..]  : remaining mlp layers (if any)
      bias block (8k rows): [tower biases x L, hash bias, wm_sim,
                             bm_eff(=mlp bias + bilin_b*wm_sim),
                             extra mlp biases, w_out row, scalar row(b_out)]
    """
    L = len(tower_dims)
    PW = max([2 * x_dim] + [2 * d for d in tower_dims] + [2 * h_dim] + list(mlp_dims))

    def pad_mat(m):
        m = np.asarray(m, np.float32)
        out = np.zeros((PW, PW), np.float32)
        out[: m.shape[0], : m.shape[1]] = m
        return out

    def pad_row(v):
        v = np.asarray(v, np.float32).reshape(-1)
        out = np.zeros((PW,), np.float32)
        out[: v.shape[0]] = v
        return out

    def block_diag(w1, w2):
        w1 = np.asarray(w1, np.float32)
        w2 = np.asarray(w2, np.float32)
        bd = np.zeros((w1.shape[0] + w2.shape[0], w1.shape[1] + w2.shape[1]), np.float32)
        bd[: w1.shape[0], : w1.shape[1]] = w1
        bd[w1.shape[0]:, w1.shape[1]:] = w2
        return bd

    mats, bias_rows = [], []

    # fused tower layers
    for (w1, b1), (w2, b2) in zip(p["tower1"], p["tower2"]):
        mats.append(pad_mat(block_diag(w1, w2)))
        bias_rows.append(pad_row(np.concatenate([np.asarray(b1), np.asarray(b2)])))

    # fused hash heads
    mats.append(pad_mat(block_diag(p["hash1"][0], p["hash2"][0])))
    bias_rows.append(pad_row(np.concatenate([np.asarray(p["hash1"][1]),
                                             np.asarray(p["hash2"][1])])))

    # bilinear: place W so (out @ Wb_pad) is lane-aligned with out2
    wb = np.zeros((PW, PW), np.float32)
    wb[:h_dim, h_dim:2 * h_dim] = np.asarray(p["bilin_w"], np.float32)
    mats.append(wb)

    # first mlp layer on x_join = [out1, sim, out2], rows permuted for `out`
    wm, bm = p["mlp"][0]
    wm = np.asarray(wm, np.float32)
    m0 = mlp_dims[0]
    wmf = np.zeros((PW, PW), np.float32)
    wmf[:h_dim, :m0] = wm[:h_dim]
    wmf[h_dim:2 * h_dim, :m0] = wm[h_dim + 1:]
    mats.append(wmf)
    wm_sim = pad_row(wm[h_dim])
    bm_eff = pad_row(bm) + float(np.asarray(p["bilin_b"])) * wm_sim

    # remaining mlp layers
    extra_bias = []
    for w, b in p["mlp"][1:]:
        mats.append(pad_mat(w))
        extra_bias.append(pad_row(b))

    bias_rows.append(wm_sim)
    bias_rows.append(bm_eff)
    bias_rows.extend(extra_bias)

    # output head: weight as a lane row, scalar bias at lane 0 of its own row
    bias_rows.append(pad_row(np.asarray(p["out"][0])[:, 0]))
    scalar_row = np.zeros((PW,), np.float32)
    scalar_row[0] = float(np.asarray(p["out"][1]).reshape(-1)[0])
    bias_rows.append(scalar_row)

    n_bias = len(bias_rows)
    n_bias_pad = -(-n_bias // 8) * 8
    bias_block = np.zeros((n_bias_pad, PW), np.float32)
    bias_block[:n_bias] = np.stack(bias_rows)

    slab = np.concatenate([np.concatenate(mats, axis=0), bias_block], axis=0)
    layout = dict(
        PW=PW,
        n_tower=L,
        n_mlp_extra=len(mlp_dims) - 1,
        n_mats=len(mats),
        bias_off=len(mats) * PW,
        n_bias_rows=n_bias_pad,
    )
    return jnp.asarray(slab), layout


# ---------------------------------------------------------------------------
# Fused Pallas kernel.
# ---------------------------------------------------------------------------
def make_kernel(layout, h_dim):
    PW = layout["PW"]
    L = layout["n_tower"]
    E = layout["n_mlp_extra"]
    bias_off = layout["bias_off"]
    nbias = layout["n_bias_rows"]

    def kernel(x_ref, slab_ref, out_ref):
        f32 = jnp.float32
        # single aligned load of all bias/row-vector parameters
        biases = slab_ref[bias_off:bias_off + nbias, :]          # (nbias, PW)

        def mat(i):  # static, sublane-aligned (PW, PW) slice of the slab
            return slab_ref[i * PW:(i + 1) * PW, :]

        # fused two-tower MLP (block-diagonal weights): one matmul per layer
        a = x_ref[...]                                            # (TB, PW)
        for l in range(L):
            a = jnp.maximum(
                jnp.dot(a, mat(l), preferred_element_type=f32) + biases[l:l + 1, :],
                0.0)

        # fused hash heads -> lanes [0:h)=out1, [h:2h)=out2, rest exactly 0
        out = jnp.dot(a, mat(L), preferred_element_type=f32) + biases[L:L + 1, :]

        # bilinear similarity: (out @ Wb_pad) is lane-aligned with out2, so
        # <out1, Wb @ out2> is one VPU multiply + one lane reduction.
        t = jnp.dot(out, mat(L + 1), preferred_element_type=f32)
        sim_dot = jnp.sum(t * out, axis=-1, keepdims=True)        # (TB, 1)

        # first mlp layer on [out1, sim, out2] without materializing the concat
        wm_sim = biases[L + 1:L + 2, :]
        bm_eff = biases[L + 2:L + 3, :]                           # bilin bias folded in
        h = jnp.dot(out, mat(L + 2), preferred_element_type=f32) \
            + sim_dot * wm_sim + bm_eff
        h = jnp.maximum(h, 0.0)

        for e in range(E):
            h = jnp.maximum(
                jnp.dot(h, mat(L + 3 + e), preferred_element_type=f32)
                + biases[L + 3 + e:L + 4 + e, :],
                0.0)

        # output head as a lane-row dot + exact sigmoid (EUP exp)
        wout = biases[L + 3 + E:L + 4 + E, :]
        b_out = biases[L + 4 + E:L + 5 + E, 0:1]                  # (1, 1)
        logits = jnp.sum(h * wout, axis=-1, keepdims=True) + b_out
        similarity = 1.0 / (1.0 + jnp.exp(-logits))

        # single lane-packed output tile: [out1 | out2 | similarity]
        out_ref[:, 0:2 * h_dim] = out[:, 0:2 * h_dim]
        out_ref[:, 2 * h_dim:2 * h_dim + 1] = similarity

    return kernel


def two_tower_forward(x1, x2, slab, *, layout, h_dim, batch_tile=256):
    B = x1.shape[0]
    PW = layout["PW"]
    out_w = 2 * h_dim + 1

    # single packed input: x1 || x2, zero-padded to the fused lane width
    x = jnp.concatenate([x1, x2], axis=1)
    if x.shape[1] < PW:
        x = jnp.pad(x, ((0, 0), (0, PW - x.shape[1])))

    TB = min(B, batch_tile)
    grid = (pl.cdiv(B, TB),)
    kernel = make_kernel(layout, h_dim)

    n_matmuls = layout["n_tower"] + 3 + layout["n_mlp_extra"]
    cost = pl.CostEstimate(
        flops=2 * B * PW * PW * n_matmuls,
        transcendentals=B,
        bytes_accessed=4 * (x.size + slab.size + B * out_w),
    )

    packed = pl.pallas_call(
        kernel,
        out_shape=jax.ShapeDtypeStruct((B, out_w), jnp.float32),
        grid_spec=pltpu.PrefetchScalarGridSpec(
            num_scalar_prefetch=0,
            grid=grid,
            in_specs=[
                pl.BlockSpec((TB, PW), lambda i: (i, 0)),        # batch-tiled input
                pl.BlockSpec(slab.shape, lambda i: (0, 0)),       # weights resident
            ],
            out_specs=pl.BlockSpec((TB, out_w), lambda i: (i, 0)),
        ),
        compiler_params=pltpu.CompilerParams(
            dimension_semantics=("parallel",)),                   # megacore on v7x
        cost_estimate=cost,
    )(x, slab)

    out1 = packed[:, 0:h_dim]
    out2 = packed[:, h_dim:2 * h_dim]
    similarity = packed[:, 2 * h_dim]                             # torch .squeeze()
    return out1, out2, similarity


# TODO(synk): use_bn=True / dropout>0 and the return_only_hash=True fast path
# are not exercised here (module defaults use_bn=False, dropout=0.0).

if __name__ == "__main__":
    B = 8
    X_DIM = 32
    TOWER_DIMS = [32, 32]
    H_DIM = 16
    MLP_DIMS = [32]

    key = jax.random.PRNGKey(0)
    kp, k1, k2 = jax.random.split(key, 3)
    params = init_params(kp, X_DIM, TOWER_DIMS, H_DIM, MLP_DIMS)
    x1 = jax.random.normal(k1, (B, X_DIM), jnp.float32)
    x2 = jax.random.normal(k2, (B, X_DIM), jnp.float32)

    slab, layout = pack_params(params, X_DIM, TOWER_DIMS, H_DIM, MLP_DIMS)

    forward = jax.jit(functools.partial(two_tower_forward, layout=layout, h_dim=H_DIM))
    out1, out2, sim = forward(x1, x2, slab)
    jax.block_until_ready((out1, out2, sim))

    r1, r2, rs = reference_forward(x1, x2, params)
    assert out1.shape == (B, H_DIM) and out2.shape == (B, H_DIM) and sim.shape == (B,)
    assert jnp.allclose(out1, r1, atol=1e-5, rtol=1e-5), "out1 mismatch"
    assert jnp.allclose(out2, r2, atol=1e-5, rtol=1e-5), "out2 mismatch"
    assert jnp.allclose(sim, rs, atol=1e-5, rtol=1e-5), "similarity mismatch"

    print("KERNEL_OK")
</pallas_src>

<mosaic_0001>
module attributes {stable_mosaic.version = 11 : i64} {
  func.func @kernel(%arg0: i32, %arg1: memref<8x64xf32, #tpu.memory_space<vmem>>, %arg2: memref<328x64xf32, #tpu.memory_space<vmem>>, %arg3: memref<8x33xf32, #tpu.memory_space<vmem>>) attributes {dimension_semantics = [#tpu.dimension_semantics<parallel>], iteration_bounds = array<i64: 1>, scalar_prefetch = 0 : i64, scratch_operands = 0 : i64, tpu.core_type = #tpu.core_type<tc>, window_params = [{transform_indices = @transform_0, window_bounds = array<i64: 8, 64>}, {pipeline_mode = #tpu.pipeline_mode<synchronous>, transform_indices = @transform_1, window_bounds = array<i64: 328, 64>}, {transform_indices = @transform_2, window_bounds = array<i64: 8, 33>}]} {
    %c320 = arith.constant 320 : index
    %c0 = arith.constant 0 : index
    %0 = vector.load %arg2[%c320, %c0] : memref<328x64xf32, #tpu.memory_space<vmem>>, vector<8x64xf32>
    %c0_0 = arith.constant 0 : index
    %c0_1 = arith.constant 0 : index
    %1 = vector.load %arg1[%c0_0, %c0_1] : memref<8x64xf32, #tpu.memory_space<vmem>>, vector<8x64xf32>
    %c0_2 = arith.constant 0 : index
    %c0_3 = arith.constant 0 : index
    %2 = vector.load %arg2[%c0_2, %c0_3] : memref<328x64xf32, #tpu.memory_space<vmem>>, vector<64x64xf32>
    %cst = arith.constant dense<0.000000e+00> : vector<8x64xf32>
    %3 = tpu.matmul %1, %2, %cst {dimension_numbers = #tpu.dot_dimension_numbers<[1], [0], [0], [1], [0, 0, 1, 1], [], []>} : vector<8x64xf32>, vector<64x64xf32>, vector<8x64xf32> -> vector<8x64xf32>
    %4 = vector.extract_strided_slice %0 {offsets = [0, 0], sizes = [1, 64], strides = [1, 1]} : vector<8x64xf32> to vector<1x64xf32>
    %5 = vector.broadcast %4 : vector<1x64xf32> to vector<8x64xf32>
    %6 = arith.addf %3, %5 : vector<8x64xf32>
    %cst_4 = arith.constant 0.000000e+00 : f32
    %7 = vector.broadcast %cst_4 : f32 to vector<8x64xf32>
    %8 = arith.maximumf %6, %7 : vector<8x64xf32>
    %c64 = arith.constant 64 : index
    %c0_5 = arith.constant 0 : index
    %9 = vector.load %arg2[%c64, %c0_5] : memref<328x64xf32, #tpu.memory_space<vmem>>, vector<64x64xf32>
    %cst_6 = arith.constant dense<0.000000e+00> : vector<8x64xf32>
    %10 = tpu.matmul %8, %9, %cst_6 {dimension_numbers = #tpu.dot_dimension_numbers<[1], [0], [0], [1], [0, 0, 1, 1], [], []>} : vector<8x64xf32>, vector<64x64xf32>, vector<8x64xf32> -> vector<8x64xf32>
    %11 = vector.extract_strided_slice %0 {offsets = [1, 0], sizes = [1, 64], strides = [1, 1]} : vector<8x64xf32> to vector<1x64xf32>
    %12 = vector.broadcast %11 : vector<1x64xf32> to vector<8x64xf32>
    %13 = arith.addf %10, %12 : vector<8x64xf32>
    %cst_7 = arith.constant 0.000000e+00 : f32
    %14 = vector.broadcast %cst_7 : f32 to vector<8x64xf32>
    %15 = arith.maximumf %13, %14 : vector<8x64xf32>
    %c128 = arith.constant 128 : index
    %c0_8 = arith.constant 0 : index
    %16 = vector.load %arg2[%c128, %c0_8] : memref<328x64xf32, #tpu.memory_space<vmem>>, vector<64x64xf32>
    %cst_9 = arith.constant dense<0.000000e+00> : vector<8x64xf32>
    %17 = tpu.matmul %15, %16, %cst_9 {dimension_numbers = #tpu.dot_dimension_numbers<[1], [0], [0], [1], [0, 0, 1, 1], [], []>} : vector<8x64xf32>, vector<64x64xf32>, vector<8x64xf32> -> vector<8x64xf32>
    %18 = vector.extract_strided_slice %0 {offsets = [2, 0], sizes = [1, 64], strides = [1, 1]} : vector<8x64xf32> to vector<1x64xf32>
    %19 = vector.broadcast %18 : vector<1x64xf32> to vector<8x64xf32>
    %20 = arith.addf %17, %19 : vector<8x64xf32>
    %c192 = arith.constant 192 : index
    %c0_10 = arith.constant 0 : index
    %21 = vector.load %arg2[%c192, %c0_10] : memref<328x64xf32, #tpu.memory_space<vmem>>, vector<64x64xf32>
    %cst_11 = arith.constant dense<0.000000e+00> : vector<8x64xf32>
    %22 = tpu.matmul %20, %21, %cst_11 {dimension_numbers = #tpu.dot_dimension_numbers<[1], [0], [0], [1], [0, 0, 1, 1], [], []>} : vector<8x64xf32>, vector<64x64xf32>, vector<8x64xf32> -> vector<8x64xf32>
    %23 = arith.mulf %22, %20 : vector<8x64xf32>
    %cst_12 = arith.constant dense<0.000000e+00> : vector<8xf32>
    %24 = vector.multi_reduction <add>, %23, %cst_12 [1] : vector<8x64xf32> to vector<8xf32>
    %25 = vector.shape_cast %24 : vector<8xf32> to vector<8x1xf32>
    %26 = vector.extract_strided_slice %0 {offsets = [3, 0], sizes = [1, 64], strides = [1, 1]} : vector<8x64xf32> to vector<1x64xf32>
    %27 = vector.extract_strided_slice %0 {offsets = [4, 0], sizes = [1, 64], strides = [1, 1]} : vector<8x64xf32> to vector<1x64xf32>
    %c256 = arith.constant 256 : index
    %c0_13 = arith.constant 0 : index
    %28 = vector.load %arg2[%c256, %c0_13] : memref<328x64xf32, #tpu.memory_space<vmem>>, vector<64x64xf32>
    %cst_14 = arith.constant dense<0.000000e+00> : vector<8x64xf32>
    %29 = tpu.matmul %20, %28, %cst_14 {dimension_numbers = #tpu.dot_dimension_numbers<[1], [0], [0], [1], [0, 0, 1, 1], [], []>} : vector<8x64xf32>, vector<64x64xf32>, vector<8x64xf32> -> vector<8x64xf32>
    %30 = vector.broadcast %25 : vector<8x1xf32> to vector<8x64xf32>
    %31 = vector.broadcast %26 : vector<1x64xf32> to vector<8x64xf32>
    %32 = arith.mulf %30, %31 : vector<8x64xf32>
    %33 = arith.addf %29, %32 : vector<8x64xf32>
    %34 = vector.broadcast %27 : vector<1x64xf32> to vector<8x64xf32>
    %35 = arith.addf %33, %34 : vector<8x64xf32>
    %cst_15 = arith.constant 0.000000e+00 : f32
    %36 = vector.broadcast %cst_15 : f32 to vector<8x64xf32>
    %37 = arith.maximumf %35, %36 : vector<8x64xf32>
    %38 = vector.extract_strided_slice %0 {offsets = [5, 0], sizes = [1, 64], strides = [1, 1]} : vector<8x64xf32> to vector<1x64xf32>
    %39 = vector.extract_strided_slice %0 {offsets = [6, 0], sizes = [1, 1], strides = [1, 1]} : vector<8x64xf32> to vector<1x1xf32>
    %40 = vector.broadcast %38 : vector<1x64xf32> to vector<8x64xf32>
    %41 = arith.mulf %37, %40 : vector<8x64xf32>
    %cst_16 = arith.constant dense<0.000000e+00> : vector<8xf32>
    %42 = vector.multi_reduction <add>, %41, %cst_16 [1] : vector<8x64xf32> to vector<8xf32>
    %43 = vector.shape_cast %42 : vector<8xf32> to vector<8x1xf32>
    %44 = vector.broadcast %39 : vector<1x1xf32> to vector<8x1xf32>
    %45 = arith.addf %43, %44 : vector<8x1xf32>
    %cst_17 = arith.constant 0.000000e+00 : f32
    %46 = vector.broadcast %cst_17 : f32 to vector<8x1xf32>
    %47 = arith.subf %46, %45 : vector<8x1xf32>
    %48 = math.exp %47 : vector<8x1xf32>
    %cst_18 = arith.constant 1.000000e+00 : f32
    %49 = vector.broadcast %cst_18 : f32 to vector<8x1xf32>
    %50 = arith.addf %49, %48 : vector<8x1xf32>
    %cst_19 = arith.constant 1.000000e+00 : f32
    %51 = vector.broadcast %cst_19 : f32 to vector<8x1xf32>
    %52 = arith.divf %51, %50 : vector<8x1xf32>
    %53 = vector.extract_strided_slice %20 {offsets = [0, 0], sizes = [8, 32], strides = [1, 1]} : vector<8x64xf32> to vector<8x32xf32>
    %c0_20 = arith.constant 0 : index
    %c0_21 = arith.constant 0 : index
    %54 = vector.load %arg3[%c0_20, %c0_21] : memref<8x33xf32, #tpu.memory_space<vmem>>, vector<8x32xf32>
    tpu.vector_store %arg3[%c0_20, %c0_21], %53 {strides = array<i32>} : memref<8x33xf32, #tpu.memory_space<vmem>>, vector<8x32xf32>,
    %c0_22 = arith.constant 0 : index
    %c32 = arith.constant 32 : index
    %55 = vector.load %arg3[%c0_22, %c32] : memref<8x33xf32, #tpu.memory_space<vmem>>, vector<8x1xf32>
    tpu.vector_store %arg3[%c0_22, %c32], %52 {strides = array<i32>} : memref<8x33xf32, #tpu.memory_space<vmem>>, vector<8x1xf32>,
    return
  }
  func.func @transform_0(%arg0: i32) -> (i32, i32) {
    %c0_i32 = arith.constant 0 : i32
    %c0_i32_0 = arith.constant 0 : i32
    return %arg0, %c0_i32 : i32, i32
  }
  func.func @transform_1(%arg0: i32) -> (i32, i32) {
    %c0_i32 = arith.constant 0 : i32
    %c0_i32_0 = arith.constant 0 : i32
    %c0_i32_1 = arith.constant 0 : i32
    return %c0_i32, %c0_i32_0 : i32, i32
  }
  func.func @transform_2(%arg0: i32) -> (i32, i32) {
    %c0_i32 = arith.constant 0 : i32
    %c0_i32_0 = arith.constant 0 : i32
    return %arg0, %c0_i32 : i32, i32
  }
}

</mosaic_0001>

<bundles_post_ra>
// kernel: two_tower_forward.1
= control target key start
LH: loop header
LB: loop body
LE: loop exit
PB: predicated region body
PF: predicated region fallthrough
CT: control target
= control target key end

     0   :  { %v689_v0 = vmov 0.0|0.0   ;;  %vm690_vm0 = vmmov 0   ;;  %v691_v4 = vmov 0.0   ;;  %vm25_vm1 = vcmask 523264   ;;  %s895_s1 = inlined_call_operand.vmem [shape: f32[328,64], index: 1, kind: input, shape index: {}]   ;;  %s896_s0 = inlined_call_operand.vmem [shape: f32[8,64], index: 0, kind: input, shape index: {}]   ;;  %s897_s2 = inlined_call_operand.vmem [shape: f32[8,33], index: 2, kind: output, shape index: {}]  }
   0x1   :  { %621 = vmatprep.subr.bf16.mxu0 %v689_v0  ;;  %v13_v1 = vld [vmem:[%s895_s1] sm:$0xff]  ;;  %v14_v2 = vld [vmem:[%s895_s1 + $0x8] sm:$0xff]  ;;  %v15_v3 = vld [vmem:[%s895_s1 + $0x10] sm:$0xff]  ;;  %542 = vmatprep.mubr.msk.f32.mxu0 %vm690_vm0, %v691_v4  ;;  %v21_v36 = vlaneseq  ;;  %vm464_vm2 = vcmask 261120   ;;  %vm470_vm3 = vcmask 269568  }
   0x2   :  { %v622_v5 = vpack.c.bf16 %v14_v2, %v13_v1  ;;  %v16_v6 = vld [vmem:[%s895_s1 + $0x18] sm:$0xff]  ;;  %633 = vmatprep.subr.bf16.mxu1 %v689_v0  ;;  %561 = vmatprep.mubr.msk.f32.mxu1 %vm690_vm0, %v691_v4  ;;  %v100_v8 = vld [vmem:[%s895_s1 + $0x40] sm:$0xff]  ;;  %v101_v9 = vld [vmem:[%s895_s1 + $0x48] sm:$0xff] }
   0x3   :  { %v625_v7 = vpack.c.bf16 %v16_v6, %v15_v3  ;;  %v102_v10 = vld [vmem:[%s895_s1 + $0x50] sm:$0xff]  ;;  %v17_v11 = vld [vmem:[%s895_s1 + $0x20] sm:$0xff]  ;;  %v18_v12 = vld [vmem:[%s895_s1 + $0x28] sm:$0xff]  ;;  %v634_v13 = vpack.c.bf16 %v101_v9, %v100_v8  ;;  %v797_v37 = vshrl.u32 %v21_v36, 7 }
   0x4   :  { %623 = vmatpush3.bf16.msra.mxu0 %v622_v5  ;;  %v103_v14 = vld [vmem:[%s895_s1 + $0x58] sm:$0xff]  ;;  %v628_v16 = vpack.c.bf16 %v18_v12, %v17_v11  ;;  %v104_v17 = vld [vmem:[%s895_s1 + $0x60] sm:$0xff]  ;;  %v105_v18 = vld [vmem:[%s895_s1 + $0x68] sm:$0xff] }
   0x5   :  { %624 = vmatprep.subr.bf16.mxu0 %v689_v0  ;;  %635 = vmatpush3.bf16.msra.mxu1 %v634_v13  ;;  %v637_v15 = vpack.c.bf16 %v103_v14, %v102_v10  ;;  %v19_v19 = vld [vmem:[%s895_s1 + $0x30] sm:$0xff]  ;;  %v20_v20 = vld [vmem:[%s895_s1 + $0x38] sm:$0xff]  ;;  %v640_v21 = vpack.c.bf16 %v105_v18, %v104_v17  ;;  %v12_v23 = vld [vmem:[%s896_s0] sm:$0xff]  ;;  %v23_v38 = vsub.s32 0, %v797_v37  ;;  %v110_v57 = vsub.s32 1, %v797_v37 }
   0x6   :  { %636 = vmatprep.subr.bf16.mxu1 %v689_v0  ;;  %v631_v22 = vpack.c.bf16 %v20_v20, %v19_v19  ;;  %v106_v24 = vld [vmem:[%s895_s1 + $0x70] sm:$0xff]  ;;  %v107_v25 = vld [vmem:[%s895_s1 + $0x78] sm:$0xff]  ;;  %v186_v27 = vld [vmem:[%s895_s1 + $0x80] sm:$0xff] }
   0x7   :  { %v643_v26 = vpack.c.bf16 %v107_v25, %v106_v24  ;;  %v187_v28 = vld [vmem:[%s895_s1 + $0x88] sm:$0xff]  ;;  %v188_v29 = vld [vmem:[%s895_s1 + $0x90] sm:$0xff]  ;;  %v189_v31 = vld [vmem:[%s895_s1 + $0x98] sm:$0xff]  ;;  %v366_v25 = vsub.s32 3, %v797_v37 }
   0x8   :  { %626 = vmatpush3.bf16.msra.mxu0 %v625_v7  ;;  %v646_v30 = vpack.c.bf16 %v187_v28, %v186_v27  ;;  %v649_v32 = vpack.c.bf16 %v189_v31, %v188_v29  ;;  %v190_v33 = vld [vmem:[%s895_s1 + $0xa0] sm:$0xff]  ;;  %v191_v34 = vld [vmem:[%s895_s1 + $0xa8] sm:$0xff]  ;;  %v192_v45 = vld [vmem:[%s895_s1 + $0xb0] sm:$0xff]  ;;  %v441_v27 = vsub.s32 4, %v797_v37  ;;  %v447_v31 = vsub.s32 5, %v797_v37 }
   0x9   :  { %627 = vmatprep.subr.bf16.mxu0 %v689_v0  ;;  %638 = vmatpush3.bf16.msra.mxu1 %v637_v15  ;;  %v652_v35 = vpack.c.bf16 %v191_v34, %v190_v33  ;;  %v803_v39 = vld [vmem:[%s895_s1 + $0x140] sm:$0xff]  ;;  %v193_v46 = vld [vmem:[%s895_s1 + $0xb8] sm:$0xff]  ;;  %v272_v49 = vld [vmem:[%s895_s1 + $0xc8] sm:$0xff] }
   0xa   :  { %639 = vmatprep.subr.bf16.mxu1 %v689_v0  ;;  %v24_v40 = vrot.slane %v803_v39, %v23_v38  ;;  %v655_v47 = vpack.c.bf16 %v193_v46, %v192_v45  ;;  %v271_v48 = vld [vmem:[%s895_s1 + $0xc0] sm:$0xff]  ;;  %v273_v51 = vld [vmem:[%s895_s1 + $0xd0] sm:$0xff]  ;;  %v274_v52 = vld [vmem:[%s895_s1 + $0xd8] sm:$0xff]  ;;  %v111_v58 = vrot.slane %v803_v39, %v110_v57  ;;  %v442_v29 = vrot.slane %v803_v39, %v441_v27 }
   0xb   :  { %v658_v50 = vpack.c.bf16 %v272_v49, %v271_v48  ;;  %v661_v53 = vpack.c.bf16 %v274_v52, %v273_v51  ;;  %v275_v54 = vld [vmem:[%s895_s1 + $0xe0] sm:$0xff]  ;;  %v276_v55 = vld [vmem:[%s895_s1 + $0xe8] sm:$0xff]  ;;  %v358_v3 = vld [vmem:[%s895_s1 + $0x110] sm:$0xff]  ;;  %v448_v34 = vrot.slane %v803_v39, %v447_v31 }
   0xc   :  { %629 = vmatpush3.bf16.msra.mxu0 %v628_v16  ;;  %v664_v56 = vpack.c.bf16 %v276_v55, %v275_v54  ;;  %v356_v59 = vld [vmem:[%s895_s1 + $0x100] sm:$0xff]  ;;  %v357_v60 = vld [vmem:[%s895_s1 + $0x108] sm:$0xff]  ;;  %v359_v5 = vld [vmem:[%s895_s1 + $0x118] sm:$0xff] }
   0xd   :  { %630 = vmatprep.subr.bf16.mxu0 %v689_v0  ;;  %641 = vmatpush3.bf16.msra.mxu1 %v640_v21  ;;  %v670_v1 = vpack.c.bf16 %v357_v60, %v356_v59  ;;  %v673_v6 = vpack.c.bf16 %v359_v5, %v358_v3  ;;  %v360_v7 = vld [vmem:[%s895_s1 + $0x120] sm:$0xff]  ;;  %v361_v8 = vld [vmem:[%s895_s1 + $0x128] sm:$0xff]  ;;  %v278_v10 = vld [vmem:[%s895_s1 + $0xf8] sm:$0xff] }
   0xe   :  { %642 = vmatprep.subr.bf16.mxu1 %v689_v0  ;;  %v676_v9 = vpack.c.bf16 %v361_v8, %v360_v7  ;;  %v362_v11 = vld [vmem:[%s895_s1 + $0x130] sm:$0xff]  ;;  %v363_v13 = vld [vmem:[%s895_s1 + $0x138] sm:$0xff] }
   0xf   :  { %v679_v14 = vpack.c.bf16 %v363_v13, %v362_v11 }
  0x10   :  { %632 = vmatpush3.bf16.msra.mxu0 %v631_v22 }
  0x11   :  { %645 = vmatprep.subr.bf16.mxu0 %v689_v0  ;;  %644 = vmatpush3.bf16.msra.mxu1 %v643_v26  ;;  %v367_v26 = vrot.slane %v803_v39, %v366_v25 }
  0x12   :  { %657 = vmatprep.subr.bf16.mxu1 %v689_v0 }
  0x13   :  { %543 = vmatmul.mubr.msk.f32.vlgmr.msra.gmra.mrb[0].mxu0 %vm25_vm1, %v12_v23 }
  0x14   :  { %580 = vmatprep.mubr.msk.f32.mxu0 %vm690_vm0, %v691_v4  ;;  %647 = vmatpush3.bf16.msra.mxu0 %v646_v30 }
  0x15   :  { %648 = vmatprep.subr.bf16.mxu0 %v689_v0 }
  0x18   :  { %650 = vmatpush3.bf16.msra.mxu0 %v649_v32 }
  0x19   :  { %651 = vmatprep.subr.bf16.mxu0 %v689_v0 }
  0x1c   :  { %653 = vmatpush3.bf16.msra.mxu0 %v652_v35 }
  0x1d   :  { %654 = vmatprep.subr.bf16.mxu0 %v689_v0 }
  0x20   :  { %656 = vmatpush3.bf16.msra.mxu0 %v655_v47 }
  0x21   :  { %669 = vmatprep.subr.bf16.mxu0 %v689_v0 }
  0xe6   :  { %v95_v41 = vpop.f32.mrb[0].mxu0 }
  0xe7   :  { %v96_v42 = vadd.f32 %v95_v41, %v24_v40  ;;  %v544_v43 = vpop.f32.mrb[1].mxu0  ;;  %v455_v40 = vsub.s32 6, %v797_v37 }
  0xe9   :  { %v99_v44 = vmax.f32 %v96_v42, 0.0  ;;  %v456_v41 = vrot.slane %v803_v39, %v455_v40 }
  0xeb   :  { %562 = vmatmul.mubr.msk.f32.vlgmr.msra.gmra.mrb[0].mxu1 %vm25_vm1, %v99_v44 }
  0xec   :  { %599 = vmatprep.mubr.msk.f32.mxu1 %vm690_vm0, %v691_v4  ;;  %659 = vmatpush3.bf16.msra.mxu1 %v658_v50 }
  0xed   :  { %660 = vmatprep.subr.bf16.mxu1 %v689_v0 }
  0xf0   :  { %662 = vmatpush3.bf16.msra.mxu1 %v661_v53 }
  0xf1   :  { %663 = vmatprep.subr.bf16.mxu1 %v689_v0 }
  0xf4   :  { %665 = vmatpush3.bf16.msra.mxu1 %v664_v56 }
  0xf5   :  { %666 = vmatprep.subr.bf16.mxu1 %v689_v0 }
 0x1be   :  { %v181_v61 = vpop.f32.mrb[0].mxu1 }
 0x1bf   :  { %v182_v62 = vadd.f32 %v181_v61, %v111_v58  ;;  %v563_v63 = vpop.f32.mrb[1].mxu1 }
 0x1c1   :  { %v185_v2 = vmax.f32 %v182_v62, 0.0 }
 0x1c3   :  { %581 = vmatmul.mubr.msk.f32.vlgmr.msra.gmra.mrb[2].mxu0 %vm25_vm1, %v185_v2 }
 0x1c4   :  { %671 = vmatpush3.bf16.msra.mxu0 %v670_v1  ;;  %618 = vmatprep.mubr.msk.f32.mxu0 %vm690_vm0, %v691_v4  ;;  %v277_v4 = vld [vmem:[%s895_s1 + $0xf0] sm:$0xff]  ;;  %s692_s1 = smov 32  }
 0x1c5   :  { %672 = vmatprep.subr.bf16.mxu0 %v689_v0  ;;  %v667_v12 = vpack.c.bf16 %v278_v10, %v277_v4 }
 0x1c7   :  { %668 = vmatpush3.bf16.msra.mxu1 %v667_v12 }
 0x1c8   :  { %674 = vmatpush3.bf16.msra.mxu0 %v673_v6 }
 0x1c9   :  { %675 = vmatprep.subr.bf16.mxu0 %v689_v0 }
 0x1cc   :  { %677 = vmatpush3.bf16.msra.mxu0 %v676_v9 }
 0x1cd   :  { %678 = vmatprep.subr.bf16.mxu0 %v689_v0  ;;  %v196_v0 = vsub.s32 2, %v797_v37 }
 0x1cf   :  { %v197_v15 = vrot.slane %v803_v39, %v196_v0 }
 0x1d0   :  { %680 = vmatpush3.bf16.msra.mxu0 %v679_v14 }
 0x296   :  { %v267_v16 = vpop.f32.mrb[2].mxu0 }
 0x297   :  { %v268_v17 = vadd.f32 %v267_v16, %v197_v15  ;;  %v582_v18 = vpop.f32.mrb[3].mxu0 }
 0x299   :  { %600 = vmatmul.mubr.msk.f32.vlgmr.msra.gmra.mrb[2].mxu1 %vm25_vm1, %v268_v17  ;;  %619 = vmatmul.mubr.msk.f32.vlgmr.msra.gmra.mrb[4].mxu0 %vm25_vm1, %v268_v17  ;;  %465 = vst.msk [vmem:[%s897_s2] sm:$0xff] %vm464_vm2, %v268_v17 }
 0x36c   :  { %v348_v19 = vpop.f32.mrb[2].mxu1  ;;  %v435_v20 = vpop.f32.mrb[4].mxu0 }
 0x36d   :  { %v352_v21 = vmul.f32 %v348_v19, %v268_v17  ;;  %v601_v22 = vpop.f32.mrb[3].mxu1  ;;  %v620_v23 = vpop.f32.mrb[5].mxu0 }
 0x36f   :  { %v353_v24 = vsel %vm25_vm1, %v352_v21, 0.0 }
 0x370   :  { %354 = vadd.xlane.f32.xlu0 %v353_v24 }
 0x3fd   :  { %v355_v28 = vpop.xlane.xlu0 %354 }
 0x3fe   :  { %v368_v30 = vmul.f32 %v367_v26, %v355_v28 }
 0x400   :  { %v436_v32 = vadd.f32 %v435_v20, %v368_v30 }
 0x402   :  { %v443_v33 = vadd.f32 %v442_v29, %v436_v32 }
 0x404   :  { %v444_v35 = vmax.f32 %v443_v33, 0.0 }
 0x406   :  { %v449_v36 = vmul.f32 %v448_v34, %v444_v35 }
 0x408   :  { %v450_v38 = vsel %vm25_vm1, %v449_v36, 0.0 }
 0x409   :  { %451 = vadd.xlane.f32.xlu0 %v450_v38 }
 0x496   :  { %v452_v42 = vpop.xlane.xlu0 %451 }
 0x497   :  { %v457_v43 = vadd.f32 %v456_v41, %v452_v42 }
 0x499   :  { %v458_v44 = vsub.f32 0.0, %v457_v43 }
 0x49b   :  { %v459_v45 = vmul.f32 1.442695, %v458_v44 }
 0x49d   :  { %685 = vpow2.f32 %v459_v45 }
 0x4a7   :  { %v686_v46 = vpop.eup %685 }
 0x4a8   :  { %v461_v47 = vadd.f32 1.0, %v686_v46 }
 0x4aa   :  { %687 = vrcp.f32 %v461_v47 }
 0x4b4   :  { %v688_v48 = vpop.eup %687 }
 0x4b5   :  { %467 = vrot.lane.b32.xlu1 %v688_v48, %s692_s1 }
 0x527   :  { %v468_v49 = vpop.permute.xlu1 %467 }
 0x528   :  { %471 = vst.msk [vmem:[%s897_s2] sm:$0xff] %vm470_vm3, %v468_v49 }

</bundles_post_ra>
